<compile_context>
chip_gen: v7x
topology: tpu7x:2x2x1
jax: 0.10.0
libtpu: 0.0.40
codegen_flags: <defaults>
</compile_context>

<pallas_src>
import functools

import jax
import jax.numpy as jnp
from jax import lax
from jax.experimental import pallas as pl
from jax.experimental.pallas import tpu as pltpu


def _round_up(x, m):
    return -(-x // m) * m


# ----------------------------------------------------------------------------
# Kernel
# ----------------------------------------------------------------------------
def _dsa_kernel(q_ref, k_ref, v_ref,
                wqr_ref, bqr_ref, wku_ref, bku_ref, wv_ref, bv_ref,
                o_ref,
                *, num_heads, head_dim, atten_dim, a_pad,
                scale_att, relu_before_att, mxu_dtype,
                softmax_bf16, approx_recip):
    A = atten_dim
    hd = head_dim
    H = num_heads

    # MXU operands in mxu_dtype (bf16 on the fast path); accumulate in f32.
    q = q_ref[0].astype(mxu_dtype)          # (S, E)
    k = k_ref[0].astype(mxu_dtype)          # (S, E)
    v = v_ref[0].astype(mxu_dtype)          # (S, E)

    # Fused projections: 3 matmuls instead of 5.  Packed weights are padded so
    # the R / U segments start at the 128-lane-aligned column `a_pad`.
    QR = jnp.dot(q, wqr_ref[...], preferred_element_type=jnp.float32) + bqr_ref[...]
    KU = jnp.dot(k, wku_ref[...], preferred_element_type=jnp.float32) + bku_ref[...]
    V = jnp.dot(v, wv_ref[...], preferred_element_type=jnp.float32) + bv_ref[...]

    Q = QR[:, :A]                  # (S, A)
    R = QR[:, a_pad:a_pad + A]     # (S, A) residual projection (never relu'd)
    K = KU[:, :A]                  # (S, A)
    U = KU[:, a_pad:a_pad + H]     # (S, H) unary term, from the *raw* key

    if relu_before_att:
        Q = jnp.maximum(Q, 0.0)
        K = jnp.maximum(K, 0.0)
        V = jnp.maximum(V, 0.0)

    # Mean-center once over the full (S, A) matrices — identical to per-head means.
    Q = Q - jnp.mean(Q, axis=0, keepdims=True)
    K = K - jnp.mean(K, axis=0, keepdims=True)
    if scale_att:
        Q = Q * (hd ** -0.5)       # fold the score scale into the (S, A) tile

    Ut = U.T                       # (H, S): one small transpose per kernel call

    Qm = Q.astype(mxu_dtype)
    Km = K.astype(mxu_dtype)
    Vm = V.astype(mxu_dtype)

    exp_dtype = jnp.bfloat16 if softmax_bf16 else jnp.float32

    dn = (((1,), (1,)), ((), ()))  # contract last dims: Qh @ Kh^T without .T
    outs = []
    for h in range(H):             # static loop; num_heads is small
        lo = h * hd
        scores = lax.dot_general(Qm[:, lo:lo + hd], Km[:, lo:lo + hd], dn,
                                 preferred_element_type=jnp.float32)   # (S, S)
        scores = scores + Ut[h:h + 1, :]                               # broadcast over rows

        # Un-normalized softmax; normalization deferred to the (S, hd) PV result.
        m = jnp.max(scores, axis=-1, keepdims=True)
        p = jnp.exp((scores - m).astype(exp_dtype))
        inv = pl.reciprocal(
            jnp.sum(p, axis=-1, keepdims=True).astype(jnp.float32),
            approx=approx_recip)                                       # (S, 1)

        pv = jnp.dot(p.astype(mxu_dtype), Vm[:, lo:lo + hd],
                     preferred_element_type=jnp.float32)               # (S, hd)
        outs.append(pv * inv + R[:, lo:lo + hd])

    # One lane-dense (S, A) store.
    o_ref[0] = jnp.concatenate(outs, axis=-1).astype(o_ref.dtype)


# ----------------------------------------------------------------------------
# Weight packing (do once per parameter set; reusable across calls)
# ----------------------------------------------------------------------------
def pack_params(params, *, num_heads, precise=False):
    E, A = params["Wq"].shape
    H = num_heads
    assert A % H == 0, "atten_dim must be divisible by num_heads"
    A_pad = _round_up(A, 128)
    H_pad = _round_up(H, 128)
    w_dtype = jnp.float32 if precise else jnp.bfloat16

    wz = lambda c: jnp.zeros((E, c), jnp.float32)
    bz = lambda c: jnp.zeros((1, c), jnp.float32)

    # query -> [Wq | pad | Wr | pad], key -> [Wk | pad | Wu | pad], value -> Wv
    wqr = jnp.concatenate(
        [params["Wq"], wz(A_pad - A), params["Wr"], wz(A_pad - A)], axis=1
    ).astype(w_dtype)
    bqr = jnp.concatenate(
        [params["bq"], bz(A_pad - A), params["br"], bz(A_pad - A)], axis=1
    ).astype(jnp.float32)
    wku = jnp.concatenate(
        [params["Wk"], wz(A_pad - A), params["Wu"], wz(H_pad - H)], axis=1
    ).astype(w_dtype)
    bku = jnp.concatenate(
        [params["bk"], bz(A_pad - A), params["bu"], bz(H_pad - H)], axis=1
    ).astype(jnp.float32)
    wv = params["Wv"].astype(w_dtype)
    bv = params["bv"].astype(jnp.float32)

    return dict(wqr=wqr, bqr=bqr, wku=wku, bku=bku, wv=wv, bv=bv,
                embed_dim=E, atten_dim=A, a_pad=A_pad, h_pad=H_pad,
                num_heads=H, precise=precise)


# ----------------------------------------------------------------------------
# Wrapper
# ----------------------------------------------------------------------------
def disentangled_self_attention(query, key, value, params=None, *, packed=None,
                                num_heads, scale_att=False,
                                relu_before_att=False, precise=False,
                                out_dtype=jnp.float32):
    if packed is None:
        packed = pack_params(params, num_heads=num_heads, precise=precise)
    assert packed["num_heads"] == num_heads and packed["precise"] == precise

    B, S, E = query.shape
    A = packed["atten_dim"]
    A_pad = packed["a_pad"]
    H_pad = packed["h_pad"]
    H = num_heads
    head_dim = A // H

    mxu_dtype = jnp.float32 if precise else jnp.bfloat16
    approx_recip = not precise

    # bf16 softmax elementwise math only where the VPU/EUP support bf16.
    try:
        dk = jax.devices()[0].device_kind.lower()
    except Exception:
        dk = ""
    softmax_bf16 = (not precise) and any(t in dk for t in ("v6", "v7"))

    kernel = functools.partial(
        _dsa_kernel,
        num_heads=H, head_dim=head_dim, atten_dim=A, a_pad=A_pad,
        scale_att=scale_att, relu_before_att=relu_before_att,
        mxu_dtype=mxu_dtype, softmax_bf16=softmax_bf16,
        approx_recip=approx_recip)

    seq_spec = pl.BlockSpec((1, S, E), lambda b: (b, 0, 0))
    full2d = lambda shape: pl.BlockSpec(shape, lambda b: (0, 0))

    W1 = 2 * A_pad          # packed [Wq | Wr] width
    W2 = A_pad + H_pad      # packed [Wk | Wu] width

    grid_spec = pltpu.PrefetchScalarGridSpec(
        num_scalar_prefetch=0,
        grid=(B,),
        in_specs=[
            seq_spec, seq_spec, seq_spec,                 # q, k, v
            full2d((E, W1)), full2d((1, W1)),             # [Wq|Wr], [bq|br]
            full2d((E, W2)), full2d((1, W2)),             # [Wk|Wu], [bk|bu]
            full2d((E, A)), full2d((1, A)),               # Wv, bv
        ],
        out_specs=pl.BlockSpec((1, S, A), lambda b: (b, 0, 0)),
    )

    # Per-step VMEM footprint (double-buffered I/O blocks + resident weights +
    # f32 intermediates + per-head (S,S) score/exp tiles) -> explicit limit
    # with headroom, capped at v7x's 64 MiB physical VMEM.
    in_bytes = 2 * 3 * S * E * query.dtype.itemsize
    out_bytes = 2 * S * A * jnp.dtype(out_dtype).itemsize
    w_bytes = 2 * sum(int(packed[n].size) * packed[n].dtype.itemsize
                      for n in ("wqr", "bqr", "wku", "bku", "wv", "bv"))
    inter_bytes = 4 * (S * (W1 + W2 + 4 * A) + 3 * S * S)
    est = in_bytes + out_bytes + w_bytes + inter_bytes
    vmem_limit = int(min(64 * 2 ** 20, max(32 * 2 ** 20, 2 * est)))

    weight_bytes = w_bytes // 2
    io_bytes = (3 * B * S * E * query.dtype.itemsize
                + B * S * A * jnp.dtype(out_dtype).itemsize)
    cost = pl.CostEstimate(
        flops=int(B * (2 * S * E * (W1 + W2 + A) + 4 * S * S * A)),
        transcendentals=int(B * H * S * S),
        bytes_accessed=int(weight_bytes + io_bytes),
    )

    return pl.pallas_call(
        kernel,
        out_shape=jax.ShapeDtypeStruct((B, S, A), out_dtype),
        grid_spec=grid_spec,
        compiler_params=pltpu.CompilerParams(
            dimension_semantics=("parallel",),
            vmem_limit_bytes=vmem_limit),
        cost_estimate=cost,
    )(query, key, value, packed["wqr"], packed["bqr"],
      packed["wku"], packed["bku"], packed["wv"], packed["bv"])


# ----------------------------------------------------------------------------
# Pure-JAX reference (mirrors the PyTorch split/cat semantics) for verification
# ----------------------------------------------------------------------------
def reference(query, key, value, params, *, num_heads, scale_att=False,
              relu_before_att=False):
    A = params["Wq"].shape[1]
    hd = A // num_heads

    Q = query @ params["Wq"] + params["bq"]
    K = key @ params["Wk"] + params["bk"]
    V = value @ params["Wv"] + params["bv"]
    if relu_before_att:
        Q, K, V = map(jax.nn.relu, (Q, K, V))
    U = key @ params["Wu"] + params["bu"]           # (B, S, H)
    R = query @ params["Wr"] + params["br"]         # (B, S, A)

    outs = []
    for h in range(num_heads):
        Qh = Q[:, :, h * hd:(h + 1) * hd]
        Kh = K[:, :, h * hd:(h + 1) * hd]
        Vh = V[:, :, h * hd:(h + 1) * hd]
        Qh = Qh - Qh.mean(axis=1, keepdims=True)
        Kh = Kh - Kh.mean(axis=1, keepdims=True)
        scores = jnp.einsum("bqd,bkd->bqk", Qh, Kh)
        if scale_att:
            scores = scores / (hd ** 0.5)
        scores = scores + U[:, :, h][:, None, :]
        p = jax.nn.softmax(scores, axis=-1)
        outs.append(jnp.einsum("bqk,bkd->bqd", p, Vh))
    return jnp.concatenate(outs, axis=-1) + R


# ----------------------------------------------------------------------------
# Main
# ----------------------------------------------------------------------------
if __name__ == "__main__":
    EMBED_DIM = 16
    ATTEN_DIM = 64
    NUM_HEADS = 2
    B, S = 2, 8

    key0 = jax.random.PRNGKey(0)
    keys = jax.random.split(key0, 16)

    def linear_init(kw, kb, fan_in, fan_out):
        bound = 1.0 / (fan_in ** 0.5)
        w = jax.random.uniform(kw, (fan_in, fan_out), jnp.float32, -bound, bound)
        b = jax.random.uniform(kb, (1, fan_out), jnp.float32, -bound, bound)
        return w, b

    Wq, bq = linear_init(keys[0], keys[1], EMBED_DIM, ATTEN_DIM)
    Wk, bk = linear_init(keys[2], keys[3], EMBED_DIM, ATTEN_DIM)
    Wv, bv = linear_init(keys[4], keys[5], EMBED_DIM, ATTEN_DIM)
    Wu, bu = linear_init(keys[6], keys[7], EMBED_DIM, NUM_HEADS)
    Wr, br = linear_init(keys[8], keys[9], EMBED_DIM, ATTEN_DIM)

    params = dict(Wq=Wq, bq=bq, Wk=Wk, bk=bk, Wv=Wv, bv=bv,
                  Wu=Wu, bu=bu, Wr=Wr, br=br)

    query = jax.random.normal(keys[10], (B, S, EMBED_DIM), jnp.float32)
    key_in = jax.random.normal(keys[11], (B, S, EMBED_DIM), jnp.float32)
    value = jax.random.normal(keys[12], (B, S, EMBED_DIM), jnp.float32)

    ref0 = reference(query, key_in, value, params, num_heads=NUM_HEADS)

    # 1) Precise path (f32 MXU, f32 softmax, exact reciprocal): strict check.
    out_p = disentangled_self_attention(query, key_in, value, params,
                                        num_heads=NUM_HEADS, precise=True)
    out_p = jax.block_until_ready(out_p)
    assert out_p.shape == (B, S, ATTEN_DIM)
    assert jnp.allclose(out_p, ref0, atol=1e-4, rtol=1e-4), "precise mismatch"

    # 2) Fast path (bf16 MXU operands, bf16 softmax on v6e/v7x, approx recip).
    #    Packed weights built once and reused across calls.
    packed_fast = pack_params(params, num_heads=NUM_HEADS, precise=False)
    out_f = disentangled_self_attention(query, key_in, value,
                                        packed=packed_fast,
                                        num_heads=NUM_HEADS, precise=False)
    out_f = jax.block_until_ready(out_f)
    assert jnp.allclose(out_f, ref0, atol=5e-2, rtol=5e-2), "fast mismatch"

    # 3) Fast path with scale_att / relu_before_att enabled (reuses packing).
    out_s = disentangled_self_attention(query, key_in, value,
                                        packed=packed_fast,
                                        num_heads=NUM_HEADS, scale_att=True,
                                        relu_before_att=True, precise=False)
    out_s = jax.block_until_ready(out_s)
    ref1 = reference(query, key_in, value, params, num_heads=NUM_HEADS,
                     scale_att=True, relu_before_att=True)
    assert jnp.allclose(out_s, ref1, atol=5e-2, rtol=5e-2), "scaled/relu mismatch"

    print("KERNEL_OK")
</pallas_src>

<mosaic_0001>
module attributes {stable_mosaic.version = 11 : i64} {
  func.func @_dsa_kernel(%arg0: i32, %arg1: memref<1x8x16xf32, #tpu.memory_space<vmem>>, %arg2: memref<1x8x16xf32, #tpu.memory_space<vmem>>, %arg3: memref<1x8x16xf32, #tpu.memory_space<vmem>>, %arg4: memref<16x256xf32, #tpu.memory_space<vmem>>, %arg5: memref<1x256xf32, #tpu.memory_space<vmem>>, %arg6: memref<16x256xf32, #tpu.memory_space<vmem>>, %arg7: memref<1x256xf32, #tpu.memory_space<vmem>>, %arg8: memref<16x64xf32, #tpu.memory_space<vmem>>, %arg9: memref<1x64xf32, #tpu.memory_space<vmem>>, %arg10: memref<1x8x64xf32, #tpu.memory_space<vmem>>) attributes {dimension_semantics = [#tpu.dimension_semantics<parallel>], iteration_bounds = array<i64: 2>, scalar_prefetch = 0 : i64, scratch_operands = 0 : i64, tpu.core_type = #tpu.core_type<tc>, window_params = [{transform_indices = @transform_0, window_bounds = array<i64: 1, 8, 16>}, {transform_indices = @transform_1, window_bounds = array<i64: 1, 8, 16>}, {transform_indices = @transform_2, window_bounds = array<i64: 1, 8, 16>}, {pipeline_mode = #tpu.pipeline_mode<synchronous>, transform_indices = @transform_3, window_bounds = array<i64: 16, 256>}, {pipeline_mode = #tpu.pipeline_mode<synchronous>, transform_indices = @transform_4, window_bounds = array<i64: 1, 256>}, {pipeline_mode = #tpu.pipeline_mode<synchronous>, transform_indices = @transform_5, window_bounds = array<i64: 16, 256>}, {pipeline_mode = #tpu.pipeline_mode<synchronous>, transform_indices = @transform_6, window_bounds = array<i64: 1, 256>}, {pipeline_mode = #tpu.pipeline_mode<synchronous>, transform_indices = @transform_7, window_bounds = array<i64: 16, 64>}, {pipeline_mode = #tpu.pipeline_mode<synchronous>, transform_indices = @transform_8, window_bounds = array<i64: 1, 64>}, {transform_indices = @transform_9, window_bounds = array<i64: 1, 8, 64>}]} {
    %c0 = arith.constant 0 : index
    %c0_0 = arith.constant 0 : index
    %c0_1 = arith.constant 0 : index
    %0 = vector.load %arg1[%c0, %c0_0, %c0_1] : memref<1x8x16xf32, #tpu.memory_space<vmem>>, vector<1x8x16xf32>
    %1 = vector.shape_cast %0 : vector<1x8x16xf32> to vector<8x16xf32>
    %c0_2 = arith.constant 0 : index
    %c0_3 = arith.constant 0 : index
    %c0_4 = arith.constant 0 : index
    %2 = vector.load %arg2[%c0_2, %c0_3, %c0_4] : memref<1x8x16xf32, #tpu.memory_space<vmem>>, vector<1x8x16xf32>
    %3 = vector.shape_cast %2 : vector<1x8x16xf32> to vector<8x16xf32>
    %c0_5 = arith.constant 0 : index
    %c0_6 = arith.constant 0 : index
    %c0_7 = arith.constant 0 : index
    %4 = vector.load %arg3[%c0_5, %c0_6, %c0_7] : memref<1x8x16xf32, #tpu.memory_space<vmem>>, vector<1x8x16xf32>
    %5 = vector.shape_cast %4 : vector<1x8x16xf32> to vector<8x16xf32>
    %c0_8 = arith.constant 0 : index
    %c0_9 = arith.constant 0 : index
    %6 = vector.load %arg4[%c0_8, %c0_9] : memref<16x256xf32, #tpu.memory_space<vmem>>, vector<16x256xf32>
    %cst = arith.constant dense<0.000000e+00> : vector<8x256xf32>
    %7 = tpu.matmul %1, %6, %cst {dimension_numbers = #tpu.dot_dimension_numbers<[1], [0], [0], [1], [0, 0, 1, 1], [], []>} : vector<8x16xf32>, vector<16x256xf32>, vector<8x256xf32> -> vector<8x256xf32>
    %c0_10 = arith.constant 0 : index
    %c0_11 = arith.constant 0 : index
    %8 = vector.load %arg5[%c0_10, %c0_11] : memref<1x256xf32, #tpu.memory_space<vmem>>, vector<1x256xf32>
    %9 = vector.broadcast %8 : vector<1x256xf32> to vector<8x256xf32>
    %10 = arith.addf %7, %9 : vector<8x256xf32>
    %c0_12 = arith.constant 0 : index
    %c0_13 = arith.constant 0 : index
    %11 = vector.load %arg6[%c0_12, %c0_13] : memref<16x256xf32, #tpu.memory_space<vmem>>, vector<16x256xf32>
    %cst_14 = arith.constant dense<0.000000e+00> : vector<8x256xf32>
    %12 = tpu.matmul %3, %11, %cst_14 {dimension_numbers = #tpu.dot_dimension_numbers<[1], [0], [0], [1], [0, 0, 1, 1], [], []>} : vector<8x16xf32>, vector<16x256xf32>, vector<8x256xf32> -> vector<8x256xf32>
    %c0_15 = arith.constant 0 : index
    %c0_16 = arith.constant 0 : index
    %13 = vector.load %arg7[%c0_15, %c0_16] : memref<1x256xf32, #tpu.memory_space<vmem>>, vector<1x256xf32>
    %14 = vector.broadcast %13 : vector<1x256xf32> to vector<8x256xf32>
    %15 = arith.addf %12, %14 : vector<8x256xf32>
    %c0_17 = arith.constant 0 : index
    %c0_18 = arith.constant 0 : index
    %16 = vector.load %arg8[%c0_17, %c0_18] : memref<16x64xf32, #tpu.memory_space<vmem>>, vector<16x64xf32>
    %cst_19 = arith.constant dense<0.000000e+00> : vector<8x64xf32>
    %17 = tpu.matmul %5, %16, %cst_19 {dimension_numbers = #tpu.dot_dimension_numbers<[1], [0], [0], [1], [0, 0, 1, 1], [], []>} : vector<8x16xf32>, vector<16x64xf32>, vector<8x64xf32> -> vector<8x64xf32>
    %c0_20 = arith.constant 0 : index
    %c0_21 = arith.constant 0 : index
    %18 = vector.load %arg9[%c0_20, %c0_21] : memref<1x64xf32, #tpu.memory_space<vmem>>, vector<1x64xf32>
    %19 = vector.broadcast %18 : vector<1x64xf32> to vector<8x64xf32>
    %20 = arith.addf %17, %19 : vector<8x64xf32>
    %21 = vector.extract_strided_slice %10 {offsets = [0, 0], sizes = [8, 64], strides = [1, 1]} : vector<8x256xf32> to vector<8x64xf32>
    %22 = vector.extract_strided_slice %10 {offsets = [0, 128], sizes = [8, 64], strides = [1, 1]} : vector<8x256xf32> to vector<8x64xf32>
    %23 = vector.extract_strided_slice %15 {offsets = [0, 0], sizes = [8, 64], strides = [1, 1]} : vector<8x256xf32> to vector<8x64xf32>
    %24 = vector.extract_strided_slice %15 {offsets = [0, 128], sizes = [8, 2], strides = [1, 1]} : vector<8x256xf32> to vector<8x2xf32>
    %cst_22 = arith.constant dense<0.000000e+00> : vector<64xf32>
    %25 = vector.multi_reduction <add>, %21, %cst_22 [0] : vector<8x64xf32> to vector<64xf32>
    %26 = vector.shape_cast %25 : vector<64xf32> to vector<1x64xf32>
    %cst_23 = arith.constant 8.000000e+00 : f32
    %27 = vector.broadcast %cst_23 : f32 to vector<1x64xf32>
    %28 = arith.divf %26, %27 : vector<1x64xf32>
    %29 = vector.broadcast %28 : vector<1x64xf32> to vector<8x64xf32>
    %30 = arith.subf %21, %29 : vector<8x64xf32>
    %cst_24 = arith.constant dense<0.000000e+00> : vector<64xf32>
    %31 = vector.multi_reduction <add>, %23, %cst_24 [0] : vector<8x64xf32> to vector<64xf32>
    %32 = vector.shape_cast %31 : vector<64xf32> to vector<1x64xf32>
    %cst_25 = arith.constant 8.000000e+00 : f32
    %33 = vector.broadcast %cst_25 : f32 to vector<1x64xf32>
    %34 = arith.divf %32, %33 : vector<1x64xf32>
    %35 = vector.broadcast %34 : vector<1x64xf32> to vector<8x64xf32>
    %36 = arith.subf %23, %35 : vector<8x64xf32>
    %37 = tpu.transpose %24, [1, 0] : vector<8x2xf32> -> vector<2x8xf32>
    %38 = vector.extract_strided_slice %30 {offsets = [0, 0], sizes = [8, 32], strides = [1, 1]} : vector<8x64xf32> to vector<8x32xf32>
    %39 = vector.extract_strided_slice %36 {offsets = [0, 0], sizes = [8, 32], strides = [1, 1]} : vector<8x64xf32> to vector<8x32xf32>
    %cst_26 = arith.constant dense<0.000000e+00> : vector<8x8xf32>
    %40 = tpu.matmul %38, %39, %cst_26 {dimension_numbers = #tpu.dot_dimension_numbers<[1], [1], [0], [0], [0, 0, 1, 0], [], []>} : vector<8x32xf32>, vector<8x32xf32>, vector<8x8xf32> -> vector<8x8xf32>
    %41 = vector.extract_strided_slice %37 {offsets = [0, 0], sizes = [1, 8], strides = [1, 1]} : vector<2x8xf32> to vector<1x8xf32>
    %42 = vector.broadcast %41 : vector<1x8xf32> to vector<8x8xf32>
    %43 = arith.addf %40, %42 : vector<8x8xf32>
    %cst_27 = arith.constant dense<0xFF800000> : vector<8xf32>
    %44 = vector.multi_reduction <maximumf>, %43, %cst_27 [1] : vector<8x8xf32> to vector<8xf32>
    %45 = vector.shape_cast %44 : vector<8xf32> to vector<8x1xf32>
    %46 = vector.broadcast %45 : vector<8x1xf32> to vector<8x8xf32>
    %47 = arith.subf %43, %46 : vector<8x8xf32>
    %48 = math.exp %47 : vector<8x8xf32>
    %cst_28 = arith.constant dense<0.000000e+00> : vector<8xf32>
    %49 = vector.multi_reduction <add>, %48, %cst_28 [1] : vector<8x8xf32> to vector<8xf32>
    %50 = vector.shape_cast %49 : vector<8xf32> to vector<8x1xf32>
    %51 = tpu.reciprocal %50 : vector<8x1xf32> -> vector<8x1xf32>
    %52 = vector.extract_strided_slice %20 {offsets = [0, 0], sizes = [8, 32], strides = [1, 1]} : vector<8x64xf32> to vector<8x32xf32>
    %cst_29 = arith.constant dense<0.000000e+00> : vector<8x32xf32>
    %53 = tpu.matmul %48, %52, %cst_29 {dimension_numbers = #tpu.dot_dimension_numbers<[1], [0], [0], [1], [0, 0, 1, 1], [], []>} : vector<8x8xf32>, vector<8x32xf32>, vector<8x32xf32> -> vector<8x32xf32>
    %54 = vector.broadcast %51 : vector<8x1xf32> to vector<8x32xf32>
    %55 = arith.mulf %53, %54 : vector<8x32xf32>
    %56 = vector.extract_strided_slice %22 {offsets = [0, 0], sizes = [8, 32], strides = [1, 1]} : vector<8x64xf32> to vector<8x32xf32>
    %57 = arith.addf %55, %56 : vector<8x32xf32>
    %58 = vector.extract_strided_slice %30 {offsets = [0, 32], sizes = [8, 32], strides = [1, 1]} : vector<8x64xf32> to vector<8x32xf32>
    %59 = vector.extract_strided_slice %36 {offsets = [0, 32], sizes = [8, 32], strides = [1, 1]} : vector<8x64xf32> to vector<8x32xf32>
    %cst_30 = arith.constant dense<0.000000e+00> : vector<8x8xf32>
    %60 = tpu.matmul %58, %59, %cst_30 {dimension_numbers = #tpu.dot_dimension_numbers<[1], [1], [0], [0], [0, 0, 1, 0], [], []>} : vector<8x32xf32>, vector<8x32xf32>, vector<8x8xf32> -> vector<8x8xf32>
    %61 = vector.extract_strided_slice %37 {offsets = [1, 0], sizes = [1, 8], strides = [1, 1]} : vector<2x8xf32> to vector<1x8xf32>
    %62 = vector.broadcast %61 : vector<1x8xf32> to vector<8x8xf32>
    %63 = arith.addf %60, %62 : vector<8x8xf32>
    %cst_31 = arith.constant dense<0xFF800000> : vector<8xf32>
    %64 = vector.multi_reduction <maximumf>, %63, %cst_31 [1] : vector<8x8xf32> to vector<8xf32>
    %65 = vector.shape_cast %64 : vector<8xf32> to vector<8x1xf32>
    %66 = vector.broadcast %65 : vector<8x1xf32> to vector<8x8xf32>
    %67 = arith.subf %63, %66 : vector<8x8xf32>
    %68 = math.exp %67 : vector<8x8xf32>
    %cst_32 = arith.constant dense<0.000000e+00> : vector<8xf32>
    %69 = vector.multi_reduction <add>, %68, %cst_32 [1] : vector<8x8xf32> to vector<8xf32>
    %70 = vector.shape_cast %69 : vector<8xf32> to vector<8x1xf32>
    %71 = tpu.reciprocal %70 : vector<8x1xf32> -> vector<8x1xf32>
    %72 = vector.extract_strided_slice %20 {offsets = [0, 32], sizes = [8, 32], strides = [1, 1]} : vector<8x64xf32> to vector<8x32xf32>
    %cst_33 = arith.constant dense<0.000000e+00> : vector<8x32xf32>
    %73 = tpu.matmul %68, %72, %cst_33 {dimension_numbers = #tpu.dot_dimension_numbers<[1], [0], [0], [1], [0, 0, 1, 1], [], []>} : vector<8x8xf32>, vector<8x32xf32>, vector<8x32xf32> -> vector<8x32xf32>
    %74 = vector.broadcast %71 : vector<8x1xf32> to vector<8x32xf32>
    %75 = arith.mulf %73, %74 : vector<8x32xf32>
    %76 = vector.extract_strided_slice %22 {offsets = [0, 32], sizes = [8, 32], strides = [1, 1]} : vector<8x64xf32> to vector<8x32xf32>
    %77 = arith.addf %75, %76 : vector<8x32xf32>
    %78 = tpu.concatenate %57, %77 in 1 : vector<8x32xf32>, vector<8x32xf32> -> vector<8x64xf32>
    %c0_34 = arith.constant 0 : index
    %c0_35 = arith.constant 0 : index
    %c0_36 = arith.constant 0 : index
    %79 = vector.load %arg10[%c0_34, %c0_35, %c0_36] : memref<1x8x64xf32, #tpu.memory_space<vmem>>, vector<1x8x64xf32>
    %80 = vector.shape_cast %79 : vector<1x8x64xf32> to vector<8x64xf32>
    %81 = vector.shape_cast %78 : vector<8x64xf32> to vector<1x8x64xf32>
    tpu.vector_store %arg10[%c0_34, %c0_35, %c0_36], %81 {strides = array<i32>} : memref<1x8x64xf32, #tpu.memory_space<vmem>>, vector<1x8x64xf32>,
    return
  }
  func.func @transform_0(%arg0: i32) -> (i32, i32, i32) {
    %c0_i32 = arith.constant 0 : i32
    %c0_i32_0 = arith.constant 0 : i32
    %c0_i32_1 = arith.constant 0 : i32
    return %arg0, %c0_i32, %c0_i32_0 : i32, i32, i32
  }
  func.func @transform_1(%arg0: i32) -> (i32, i32, i32) {
    %c0_i32 = arith.constant 0 : i32
    %c0_i32_0 = arith.constant 0 : i32
    %c0_i32_1 = arith.constant 0 : i32
    return %arg0, %c0_i32, %c0_i32_0 : i32, i32, i32
  }
  func.func @transform_2(%arg0: i32) -> (i32, i32, i32) {
    %c0_i32 = arith.constant 0 : i32
    %c0_i32_0 = arith.constant 0 : i32
    %c0_i32_1 = arith.constant 0 : i32
    return %arg0, %c0_i32, %c0_i32_0 : i32, i32, i32
  }
  func.func @transform_3(%arg0: i32) -> (i32, i32) {
    %c0_i32 = arith.constant 0 : i32
    %c0_i32_0 = arith.constant 0 : i32
    %c0_i32_1 = arith.constant 0 : i32
    return %c0_i32, %c0_i32_0 : i32, i32
  }
  func.func @transform_4(%arg0: i32) -> (i32, i32) {
    %c0_i32 = arith.constant 0 : i32
    %c0_i32_0 = arith.constant 0 : i32
    %c0_i32_1 = arith.constant 0 : i32
    return %c0_i32, %c0_i32_0 : i32, i32
  }
  func.func @transform_5(%arg0: i32) -> (i32, i32) {
    %c0_i32 = arith.constant 0 : i32
    %c0_i32_0 = arith.constant 0 : i32
    %c0_i32_1 = arith.constant 0 : i32
    return %c0_i32, %c0_i32_0 : i32, i32
  }
  func.func @transform_6(%arg0: i32) -> (i32, i32) {
    %c0_i32 = arith.constant 0 : i32
    %c0_i32_0 = arith.constant 0 : i32
    %c0_i32_1 = arith.constant 0 : i32
    return %c0_i32, %c0_i32_0 : i32, i32
  }
  func.func @transform_7(%arg0: i32) -> (i32, i32) {
    %c0_i32 = arith.constant 0 : i32
    %c0_i32_0 = arith.constant 0 : i32
    %c0_i32_1 = arith.constant 0 : i32
    return %c0_i32, %c0_i32_0 : i32, i32
  }
  func.func @transform_8(%arg0: i32) -> (i32, i32) {
    %c0_i32 = arith.constant 0 : i32
    %c0_i32_0 = arith.constant 0 : i32
    %c0_i32_1 = arith.constant 0 : i32
    return %c0_i32, %c0_i32_0 : i32, i32
  }
  func.func @transform_9(%arg0: i32) -> (i32, i32, i32) {
    %c0_i32 = arith.constant 0 : i32
    %c0_i32_0 = arith.constant 0 : i32
    %c0_i32_1 = arith.constant 0 : i32
    return %arg0, %c0_i32, %c0_i32_0 : i32, i32, i32
  }
}

</mosaic_0001>

<bundles_post_ra>
// kernel: tpu_custom_call.1
= control target key start
LH: loop header
LB: loop body
LE: loop exit
PB: predicated region body
PF: predicated region fallthrough
CT: control target
= control target key end

     0   :  { %s2093_s0 = inlined_call_operand.hbm [shape: f32[2,8,16], index: 0, kind: input, shape index: {}]   ;;  %s2094_s1 = inlined_call_operand.hbm [shape: f32[2,8,16], index: 1, kind: input, shape index: {}]   ;;  %s2095_s2 = inlined_call_operand.hbm [shape: f32[2,8,16], index: 2, kind: input, shape index: {}]   ;;  %s2096_s3 = inlined_call_operand.hbm [shape: f32[16,256], index: 3, kind: input, shape index: {}]   ;;  %s2097_s4 = inlined_call_operand.vmem [shape: f32[1,256], index: 4, kind: input, shape index: {}]   ;;  %s2098_s5 = inlined_call_operand.hbm [shape: f32[16,256], index: 5, kind: input, shape index: {}]   ;;  %s2099_s6 = inlined_call_operand.vmem [shape: f32[1,256], index: 6, kind: input, shape index: {}]   ;;  %s2100_s7 = inlined_call_operand.vmem [shape: f32[16,64], index: 7, kind: input, shape index: {}]   ;;  %s2101_s8 = inlined_call_operand.vmem [shape: f32[1,64], index: 8, kind: input, shape index: {}]   ;;  %s2102_s9 = inlined_call_operand.hbm [shape: f32[2,8,64], index: 9, kind: output, shape index: {}]  }
   0x1   :  { %2122 = sst [smem:[#allocation21_spill]] %s2094_s1 }
   0x2   :  { %2123 = sst [smem:[#allocation22_spill]] %s2096_s3 }
   0x3   :  { %14 = vsyncpa [#allocation3], 0 }
   0x4   :  { %16 = vsyncpa [#allocation3 + $0x1], 0 }
   0x5   :  { %17 = vsyncpa [#allocation6], 0 }
   0x6   :  { %19 = vsyncpa [#allocation6 + $0x1], 0 }
   0x7   :  { %20 = vsyncpa [#allocation9], 0 }
   0x8   :  { %21 = vsyncpa [#allocation4], 0 }
   0x9   :  { %23 = vsyncpa [#allocation4 + $0x1], 0  ;;  %s1718_s30 = smov 0   ;;  %s1720_s10 = smov 0  }
   0xa   :  { %s1722_s11 = smov 0   ;;  %s1724_s12 = smov 0  }
   0xb LB: > { %2124 = sst [smem:[#allocation16_spill]] %s1641_s30  ;;  %s1739_s13 = sadd.s32 4294967295, %s1653_s12   ;;  %s1653_s12 = sphi %s1724_s12, %s2158_s12   ;;  %s1649_s11 = sphi %s1722_s11, %s2162_s11   ;;  %s1645_s10 = sphi %s1720_s10, %s2161_s10   ;;  %s1641_s30 = sphi %s1718_s30, %s2160_s30  }
   0xc   : > { %2125 = sst [smem:[#allocation17_spill]] %s1653_s12  ;;  %s1260_s14 = sadd.s32 4294967294, %s1653_s12  }
   0xd   : > { %p49_p0 = scmp.ne.s32.totalorder %s1645_s10, %s1641_s30  ;;  %p2103_p1 = scmp.eq.s32.totalorder %s1739_s13, 0 }
   0xe   : > { %p257_p3 = scmp.eq.s32.totalorder %s1260_s14, 1  ;;  %p1261_p5 = scmp.ge.s32.totalorder %s1653_s12, 1 }
   0xf   : > { %p1748_p4 = por %p2103_p1, %p49_p0  ;;  %p264_p7 = scmp.lt.s32.totalorder %s1653_s12, 3 }
  0x10   : > { %p1753_p6 = por %p257_p3, %p49_p0  ;;  %s1655_s18 = smov [#allocation8]  }
  0x11   : > { %s2126_s15 = scalar_select %p1748_p4, 1, 0 }
  0x12   : > { %s2127_s16 = scalar_select %p1753_p6, 1, 0 }
  0x13   : > { %p1758_p8 = pnand %p1261_p5, %p264_p7  ;;  %s276_s19 = sshll.u32 %s1655_s18, 4  ;;  %s1762_s19 = int_to_ptr.vmem [resolvable:$true] %s276_s19 }
  0x14   : > { %2128 = sst [smem:[#allocation18_spill]] %s2127_s16  ;;  %s1774_s21 = sadd.s32 1, %s1653_s12  }
  0x15   : > { %s2129_s17 = scalar_select %p1758_p8, 1, 0 }
  0x16   : > { %p1357_p9 = pneg %p1758_p8  ;;  %2131 = sst [smem:[#allocation19_spill]] %s1774_s21 }
  0x17   : > { %s36_s22 = sadd.s32 1, %s1649_s11  ;;  %s33_s23 = ssub.s32 %s1653_s12, %s1774_s21 }
  0x18   : > { %p1769_p11 = pnand %p1357_p9, %p2103_p1  ;;  %s2132_s3 = sld [smem:[#allocation22_spill]] }
  0x1a   : > { %s2130_s20 = scalar_select %p1769_p11, 1, 0 }
  0x1b   : > { %p2111_p13 = pneg %p1769_p11 }
  0x1e   : > { %s1433_s26 = scalar_lea.hbm %s2132_s3, 512 }
  0x1f   : > { %p1434_p12 = scmp.ne.s32.totalorder %s2132_s3, %s1433_s26  ;;  %p1440_p5 = scmp.lt.u32.totalorder %s1433_s26, %s2132_s3 }
  0x21   : > { %p1436_p0 = pnand %p2111_p13, %p1434_p12 }
  0x23   : > { %p1437_p3 = pneg %p1436_p0 }
  0x25   : > { %p1442_p7 = pnand %p1440_p5, %p1437_p3 }
  0x27   : > { %1445 = shalt.err (!%p1442_p7)
}
  0x28   : > { %s1446_s18 = scalar_lea.vmem %s1762_s19, 512  ;;  %p1454_p2 = scmp.lt.s32.totalorder %s1762_s19, %s1762_s19 }
  0x29   : > { %p1447_p9 = scmp.ne.s32.totalorder %s1762_s19, %s1446_s18  ;;  %p1455_p12 = scmp.lt.s32.totalorder %s1446_s18, %s1446_s18 }
  0x2b   : > { %p1449_p10 = pnand %p1447_p9, %p2111_p13  ;;  %p1456_p0 = por %p1455_p12, %p1454_p2 }
  0x2d   : > { %p1450_p1 = pneg %p1449_p10 }
  0x2f   : > { %p1457_p6 = pnand %p1456_p0, %p1450_p1 }
  0x31   : > { %1460 = shalt.err (!%p1457_p6)
}
  0x32   : > { %s2106_s24 = smov 256   ;;  %s2107_s25 = smov 16  }
  0x33   : > { %1360 = dma.hbm_to_vmem [thread:$0]  (!%p1769_p11), %s2132_s3, 512, %s1762_s19, [#allocation9], %s2106_s24, %s2106_s24, %s2107_s25  }
  0x34   : > { %p34_p1 = scmp.eq.s32.totalorder %s33_s23, 0  ;;  %p43_p2 = scmp.ne.s32.totalorder %s1649_s11, %s1645_s10 }
  0x35   : > { %p44_p6 = scmp.eq.s32.totalorder %s1653_s12, 0  ;;  %p1380_p10 = scmp.lt.s32.totalorder %s1653_s12, 2 }
  0x36   : > { %s1814_s28 = scalar_select %p34_p1, %s1649_s11, %s36_s22  }
  0x37   : > { %p45_p3 = por %p44_p6, %p43_p2  ;;  %p2134_p5 = scmp.eq.s32.totalorder %s1739_s13, 1 }
  0x38   : > { %2133 = sst [smem:[#allocation20_spill]] %s1814_s28  ;;  %s2108_s14 = sand.u32 1, %s1649_s11  }
  0x39   : > { %p1818_p7 = por %p2134_p5, %p43_p2  ;;  %s1824_s18 = sshll.u32 %s1653_s12, 7 }
  0x3a   : > { %s1828_s21 = sshll.u32 %s2108_s14, 3  ;;  %p1830_p9 = pnand %p1380_p10, %p45_p3 }
  0x3b   : > { %s2135_s29 = scalar_select %p1818_p7, 1, 0 }
  0x3c   : > { %s2136_s19 = scalar_select %p1830_p9, 1, 0 }
  0x3d   : > { %s333_s22 = sand.u32 1, %s1653_s12   ;;  %s2137_s1 = sld [smem:[#allocation21_spill]] }
  0x3e   : > { %s337_s24 = scalar_lea.vmem [#allocation5], %s1828_s21  ;;  %s1844_s14 = scalar_lea.sflag [#allocation6], %s333_s22 }
  0x3f   : > { %s344_s25 = sshll.u32 %s337_s24, 4  ;;  %p1850_p0 = pneg %p1830_p9  ;;  %s1842_s25 = int_to_ptr.vmem [resolvable:$true] %s344_s25 }
  0x41   : > { %s2138_s28 = scalar_select %p1850_p0, 1, 0 }
  0x43   : > { %s1839_s27 = scalar_lea.hbm %s2137_s1, %s1824_s18  ;;  %s1466_s12 = scalar_lea.hbm %s2137_s1, 256 }
  0x44   : > { %s1461_s3 = scalar_lea.hbm %s1839_s27, 128  ;;  %p1467_p6 = scmp.lt.u32.totalorder %s1839_s27, %s2137_s1 }
  0x45   : > { %p1462_p12 = scmp.ne.s32.totalorder %s1839_s27, %s1461_s3  ;;  %p1468_p10 = scmp.lt.u32.totalorder %s1466_s12, %s1461_s3 }
  0x46   : > { %p1470_p5 = scmp.lt.u32.totalorder %s1461_s3, %s1839_s27 }
  0x47   : > { %p1464_p1 = pnand %p1850_p0, %p1462_p12  ;;  %p1469_p3 = por %p1468_p10, %p1467_p6 }
  0x49   : > { %p1465_p2 = pneg %p1464_p1  ;;  %p1471_p13 = por %p1470_p5, %p1469_p3 }
  0x4b   : > { %p1472_p7 = pnand %p1471_p13, %p1465_p2 }
  0x4d   : > { %1475 = shalt.err (!%p1472_p7)
}
  0x4e   : > { %s1476_s22 = scalar_lea.vmem %s1842_s25, 128  ;;  %s1658_s23 = smov [#allocation5]  }
  0x4f   : > { %p1477_p12 = scmp.ne.s32.totalorder %s1842_s25, %s1476_s22  ;;  %s1481_s26 = sshll.u32 %s1658_s23, 4  ;;  %s1482_s26 = int_to_ptr.vmem [resolvable:$false] %s1481_s26 }
  0x50   : > { %s1483_s16 = scalar_lea.vmem %s1482_s26, 256  ;;  %p1484_p8 = scmp.lt.s32.totalorder %s1842_s25, %s1482_s26 }
  0x51   : > { %p1479_p1 = pnand %p1477_p12, %p1850_p0  ;;  %p1485_p11 = scmp.lt.s32.totalorder %s1483_s16, %s1476_s22 }
  0x53   : > { %p1480_p4 = pneg %p1479_p1  ;;  %p1486_p6 = por %p1485_p11, %p1484_p8 }
  0x55   : > { %p1487_p10 = pnand %p1486_p6, %p1480_p4 }
  0x57   : > { %1490 = shalt.err (!%p1487_p10)
}
  0x58   : > { %1370 = dma.hbm_to_vmem [thread:$0]  (!%p1830_p9), %s1839_s27, 128, %s1842_s25, %s1844_s14  }
  0x59   : > { %s1659_s3 = smov [#allocation10]   ;;  %s1491_s23 = scalar_lea.hbm %s2098_s5, 512 }
  0x5a   : > { %s292_s12 = sshll.u32 %s1659_s3, 4  ;;  %p1492_p8 = scmp.ne.s32.totalorder %s2098_s5, %s1491_s23  ;;  %s293_s12 = int_to_ptr.vmem [resolvable:$true] %s292_s12 }
  0x5b   : > { %p2139_p4 = scmp.ne.s32.totalorder %s2130_s20, 0  ;;  %p1498_p2 = scmp.lt.u32.totalorder %s1491_s23, %s2098_s5 }
  0x5d   : > { %p2140_p11 = pneg %p2139_p4 }
  0x5f   : > { %p1494_p13 = pnand %p1492_p8, %p2140_p11 }
  0x61   : > { %p1495_p7 = pneg %p1494_p13 }
  0x63   : > { %p1500_p3 = pnand %p1498_p2, %p1495_p7 }
  0x65   : > { %1503 = shalt.err (!%p1500_p3)
}
  0x66   : > { %s1504_s25 = scalar_lea.vmem %s293_s12, 512  ;;  %p2141_p12 = pmov %p2140_p11 }
  0x67   : > { %p1505_p5 = scmp.ne.s32.totalorder %s293_s12, %s1504_s25  ;;  %p1512_p10 = scmp.lt.s32.totalorder %s293_s12, %s293_s12 }
  0x68   : > { %p1513_p9 = scmp.lt.s32.totalorder %s1504_s25, %s1504_s25 }
  0x69   : > { %p1507_p1 = pnand %p1505_p5, %p2141_p12 }
  0x6a   : > { %p1514_p0 = por %p1513_p9, %p1512_p10 }
  0x6b   : > { %p1508_p6 = pneg %p1507_p1 }
  0x6d   : > { %p1515_p8 = pnand %p1514_p0, %p1508_p6 }
  0x6f   : > { %1518 = shalt.err (!%p1515_p8)
}
  0x70   : > { %s2142_s1 = smov 16   ;;  %s2143_s30 = smov 256  }
  0x71   : > { %1363 = dma.hbm_to_vmem [thread:$0]  (!%p2139_p4), %s2098_s5, 512, %s293_s12, [#allocation9], %s2143_s30, %s2143_s30, %s2142_s1  }
  0x72   : > { %s1901_s26 = scalar_lea.hbm %s2093_s0, %s1824_s18  ;;  %s319_s20 = scalar_lea.vmem [#allocation2], %s1828_s21 }
  0x73   : > { %s326_s22 = sshll.u32 %s319_s20, 4  ;;  %s2144_s16 = sand.u32 1, %s1649_s11   ;;  %s327_s22 = int_to_ptr.vmem [resolvable:$true] %s326_s22 }
  0x74   : > { %s316_s25 = scalar_lea.sflag [#allocation3], %s2144_s16  ;;  %s1519_s27 = scalar_lea.hbm %s1901_s26, 128 }
  0x75   : > { %p1520_p9 = scmp.ne.s32.totalorder %s1901_s26, %s1519_s27  ;;  %p2145_p0 = scmp.ne.s32.totalorder %s2138_s28, 0 }
  0x76   : > { %s1524_s30 = scalar_lea.hbm %s2093_s0, 256  ;;  %p1525_p4 = scmp.lt.u32.totalorder %s1901_s26, %s2093_s0 }
  0x77   : > { %p1522_p11 = pnand %p1520_p9, %p2145_p0  ;;  %p1526_p7 = scmp.lt.u32.totalorder %s1524_s30, %s1519_s27 }
  0x78   : > { %p1528_p3 = scmp.lt.u32.totalorder %s1519_s27, %s1901_s26 }
  0x79   : > { %p1523_p13 = pneg %p1522_p11  ;;  %p1527_p2 = por %p1526_p7, %p1525_p4 }
  0x7b   : > { %p1529_p5 = por %p1528_p3, %p1527_p2 }
  0x7d   : > { %p1530_p12 = pnand %p1529_p5, %p1523_p13 }
  0x7f   : > { %1533 = shalt.err (!%p1530_p12)
}
  0x80   : > { %s1534_s23 = scalar_lea.vmem %s327_s22, 128  ;;  %s1660_s20 = smov [#allocation2]  }
  0x81   : > { %p1535_p1 = scmp.ne.s32.totalorder %s327_s22, %s1534_s23  ;;  %s1539_s16 = sshll.u32 %s1660_s20, 4  ;;  %s1540_s16 = int_to_ptr.vmem [resolvable:$false] %s1539_s16 }
  0x82   : > { %s1541_s12 = scalar_lea.vmem %s1540_s16, 256  ;;  %p1542_p8 = scmp.lt.s32.totalorder %s327_s22, %s1540_s16 }
  0x83   : > { %p1537_p6 = pnand %p1535_p1, %p2145_p0  ;;  %p1543_p9 = scmp.lt.s32.totalorder %s1541_s12, %s1534_s23 }
  0x85   : > { %p1538_p10 = pneg %p1537_p6  ;;  %p1544_p11 = por %p1543_p9, %p1542_p8 }
  0x87   : > { %p1545_p4 = pnand %p1544_p11, %p1538_p10 }
  0x89   : > { %1548 = shalt.err (!%p1545_p4)
}
  0x8a   : > { %p2146_p7 = scmp.ne.s32.totalorder %s2136_s19, 0  ;;  %s1927_s30 = scalar_lea.hbm %s2095_s2, %s1824_s18 }
  0x8b   : > { %s355_s3 = scalar_lea.vmem [#allocation7], %s1828_s21  ;;  %s1549_s23 = scalar_lea.hbm %s1927_s30, 128 }
  0x8c   : > { %1367 = dma.hbm_to_vmem [thread:$0]  (!%p2146_p7), %s1901_s26, 128, %s327_s22, %s316_s25  }
  0x8d   : > { %s362_s24 = sshll.u32 %s355_s3, 4  ;;  %p1550_p13 = scmp.ne.s32.totalorder %s1927_s30, %s1549_s23  ;;  %s363_s24 = int_to_ptr.vmem [resolvable:$true] %s362_s24 }
  0x8e   : > { %s1554_s26 = scalar_lea.hbm %s2095_s2, 256  ;;  %p1555_p5 = scmp.lt.u32.totalorder %s1927_s30, %s2095_s2 }
  0x8f   : > { %p1552_p2 = pnand %p1550_p13, %p2145_p0  ;;  %p1556_p12 = scmp.lt.u32.totalorder %s1554_s26, %s1549_s23 }
  0x90   : > { %p1558_p6 = scmp.lt.u32.totalorder %s1549_s23, %s1927_s30 }
  0x91   : > { %p1553_p3 = pneg %p1552_p2  ;;  %p1557_p1 = por %p1556_p12, %p1555_p5 }
  0x93   : > { %p1559_p10 = por %p1558_p6, %p1557_p1 }
  0x95   : > { %p1560_p8 = pnand %p1559_p10, %p1553_p3 }
  0x97   : > { %1563 = shalt.err (!%p1560_p8)
}
  0x98   : > { %s1564_s21 = scalar_lea.vmem %s363_s24, 128  ;;  %s1661_s18 = smov [#allocation7]  }
  0x99   : > { %p1565_p9 = scmp.ne.s32.totalorder %s363_s24, %s1564_s21  ;;  %s1569_s12 = sshll.u32 %s1661_s18, 4  ;;  %s1570_s12 = int_to_ptr.vmem [resolvable:$false] %s1569_s12 }
  0x9a   : > { %s1571_s27 = scalar_lea.vmem %s1570_s12, 256  ;;  %p1572_p13 = scmp.lt.s32.totalorder %s363_s24, %s1570_s12 }
  0x9b   : > { %p1567_p11 = pnand %p1565_p9, %p2145_p0  ;;  %p1573_p2 = scmp.lt.s32.totalorder %s1571_s27, %s1564_s21 }
  0x9d   : > { %p1568_p4 = pneg %p1567_p11  ;;  %p1574_p7 = por %p1573_p2, %p1572_p13 }
  0x9f   : > { %p1575_p5 = pnand %p1574_p7, %p1568_p4 }
  0xa1   : > { %1578 = shalt.err (!%p1575_p5)
}
  0xa2   : > { %p2147_p12 = scmp.ne.s32.totalorder %s2136_s19, 0  ;;  %p2148_p3 = scmp.ne.s32.totalorder %s2129_s17, 0 }
  0xa3   : > { %s1951_s28 = sand.u32 (!%p2148_p3), 1, %s1645_s10   ;;  %p2149_p0 = scmp.ne.s32.totalorder (!%p2148_p3), %s2126_s15, 0 }
  0xa4   : > { %1373 = dma.hbm_to_vmem [thread:$0]  (!%p2147_p12), %s1927_s30, 128, %s363_s24, %s1844_s14  }
  0xa5   : > { %371 = sbr.rel (%p2148_p3) target bundleno = 1256 (0x4e8), region = 56  ;;  %s1954_s1 = sshll.u32 (!%p2148_p3), %s1951_s28, 3 }
  0xa6   : > { %s374_s3 = scalar_lea.sflag (!%p2148_p3), [#allocation3], %s1951_s28  ;;  %s377_s23 = scalar_lea.vmem (!%p2148_p3), [#allocation2], %s1954_s1 }
  0xac   : > { %1624 = dma.done.wait (%p2149_p0), %s374_s3, 128  }
  0xad   : > { %1626 = vsyncadd (%p2149_p0), %s374_s3, 4294967168  ;;  %s382_s17 = sand.u32 1, %s1739_s13   ;;  %s386_s19 = scalar_lea.vmem [#allocation5], %s1954_s1 }
  0xae   : > { %s383_s14 = scalar_lea.sflag [#allocation6], %s382_s17 }
  0xaf   : > { %1628 = dma.done.wait (%p2149_p0), %s383_s14, 256  }
  0xb0   : > { %1630 = vsyncadd (%p2149_p0), %s383_s14, 4294967040  ;;  %s395_s30 = scalar_lea.vmem [#allocation7], %s1954_s1  ;;  %p2150_p7 = scmp.eq.s32.totalorder %s1739_s13, 0 }
  0xb2   : > { %1632 = dma.done.wait (%p2150_p7), [#allocation9], 1024   ;;  %p2151_p1 = pmov %p2150_p7 }
  0xb3   : > { %v1662_v0 = vmov 0.0   ;;  %v452_v1 = vld [vmem:[#allocation8 + $0x8] sm:$0xff]  ;;  %v454_v2 = vld [vmem:[#allocation8 + $0x18] sm:$0xff]  ;;  %v451_v6 = vld [vmem:[#allocation8] sm:$0xff]  ;;  %vm467_vm0 = vcmask 130048   ;;  %vm1663_vm1 = vmmov 0   ;;  %v457_v15 = vlaneseq }
  0xb4   : > { %1634 = vsyncadd (%p2151_p1), [#allocation9], 4294966272  ;;  %535 = vmatprep.mubr.f32.mxu0 %v1662_v0  ;;  %625 = vmatprep.mubr.f32.mxu1 %v1662_v0  ;;  %v543_v3 = vld [vmem:[#allocation10 + $0x8] sm:$0xff]  ;;  %v1330_v4 = vpack.c.bf16 %v454_v2, %v452_v1  ;;  %v545_v5 = vld [vmem:[#allocation10 + $0x18] sm:$0xff]  ;;  %vm714_vm2 = vcmask 523264   ;;  %v1664_v45 = vmov 0.0|0.0  }
  0xb5   : > { %v453_v7 = vld [vmem:[#allocation8 + $0x10] sm:$0xff]  ;;  %v1334_v8 = vpack.c.bf16 %v545_v5, %v543_v3  ;;  %v542_v10 = vld [vmem:[#allocation10] sm:$0xff]  ;;  %v458_v16 = vshrl.u32 %v457_v15, 7  ;;  %v633_v43 = vld [vmem:[%s2100_s7 + $0x8] sm:$0xff]  ;;  %vm770_vm3 = vcmask 261120   ;;  %s1665_s18 = smov 96  }
  0xb6   : > { %v1332_v9 = vpack.c.bf16 %v453_v7, %v451_v6  ;;  %v544_v11 = vld [vmem:[#allocation10 + $0x10] sm:$0xff]  ;;  %1331 = vmatprep.subr.bf16.mxu0 %v1330_v4  ;;  %v449_v14 = vld [vmem:[%s386_s19] sm:$0xff]  ;;  %vm847_vm4 = vcmask 64512   ;;  %s1666_s3 = smov 32   ;;  %s447_s17 = scalar_lea.vmem [#allocation11], %s1954_s1 }
  0xb7   : > { %v1336_v12 = vpack.c.bf16 %v544_v11, %v542_v10  ;;  %1335 = vmatprep.subr.bf16.mxu1 %v1334_v8  ;;  %v448_v13 = vld [vmem:[%s377_s23] sm:$0xff]  ;;  %v1982_v17 = vsub.s32 0, %v458_v16  ;;  %v1992_v20 = vsub.s32 1, %v458_v16  ;;  %s1289_s23 = sshll.u32 %s1739_s13, 7  ;;  %s1128_s14 = sshll.u32 %s447_s17, 4  ;;  %s2049_s14 = int_to_ptr.vmem [resolvable:$true] %s1128_s14 }
  0xb8   : > { %1333 = vmatpush1.bf16.msra.mxu0 %v1332_v9  ;;  %v1987_v18 = vld [vmem:[%s2097_s4] sm:$0x3]  ;;  %s2047_s15 = scalar_lea.hbm %s2102_s9, %s1289_s23  ;;  %s1115_s24 = scalar_lea.sflag [#allocation4], %s1951_s28 }
  0xb9   : > { %1337 = vmatpush1.bf16.msra.mxu1 %v1336_v12  ;;  %v546_v19 = vld [vmem:[%s2099_s6] sm:$0x3]  ;;  %v460_v21 = vrot.slane %v1987_v18, %v1982_v17  ;;  %1338 = vmatprep.subr.bf16.mxu0 %v1664_v45  ;;  %s1579_s13 = scalar_lea.vmem %s2049_s14, 128  ;;  %p2152_p10 = scmp.ne.s32.totalorder %s2135_s29, 0 }
  0xba   : > { %1310 = vmatprep.subr.mxu1 %v1662_v0  ;;  %v551_v22 = vrot.slane %v546_v19, %v1982_v17  ;;  %v555_v23 = vrot.slane %v546_v19, %v1992_v20  ;;  %v632_v42 = vld [vmem:[%s2100_s7] sm:$0xff]  ;;  %p1580_p6 = scmp.ne.s32.totalorder %s2049_s14, %s1579_s13  ;;  %s1667_s1 = smov [#allocation11]  }
  0xbb   : > { %1278 = vmatmul.mubr.msk.f32.vlgmr.msra.gmra.mrb[0].mxu0 %vm467_vm0, %v448_v13  ;;  %v1339_v46 = vpack.c.bf16 %v633_v43, %v632_v42  ;;  %v450_v49 = vld [vmem:[%s395_s30] sm:$0xff]  ;;  %s1583_s20 = sshll.u32 %s1667_s1, 4  ;;  %s1584_s20 = int_to_ptr.vmem [resolvable:$false] %s1583_s20 }
  0xbc   : > { %1279 = vmatmul.mubr.msk.f32.vlgmr.msra.gmra.mrb[0].mxu1 %vm467_vm0, %v449_v14  ;;  %1307 = vmatprep.mubr.msk.f32.mxu0 %vm1663_vm1, %v1662_v0  ;;  %v1280_v56 = vld [vmem:[%s2101_s8] ss:$0 sm:$0xff]  ;;  %p1581_p8 = pnand %p1580_p6, %p2152_p10  ;;  %s1585_s16 = scalar_lea.vmem %s1584_s20, 256 }
  0xbd   : > { %1312 = vmatprep.mubr.msk.f32.mxu1 %vm1663_vm1, %v1662_v0  ;;  %1340 = vmatpush3.bf16.msra.mxu0 %v1339_v46  ;;  %p1586_p11 = scmp.lt.s32.totalorder %s2049_s14, %s1584_s20  ;;  %p1587_p4 = scmp.lt.s32.totalorder %s1585_s16, %s1579_s13 }
  0xbe   : > { %1315 = vmatprep.subr.mxu0 %v1662_v0  ;;  %p1582_p9 = pneg %p1581_p8 }
  0xbf   : > { %p1588_p13 = por %p1587_p4, %p1586_p11 }
  0xc0   : > { %1308 = vmatmul.mubr.msk.f32.vlgmr.msra.gmra.mrb[2].mxu0 %vm467_vm0, %v450_v49 }
  0xc1   : > { %1317 = vmatprep.mubr.msk.f32.mxu0 %vm1663_vm1, %v1662_v0  ;;  %p1589_p2 = pnand %p1588_p13, %p1582_p9 }
 0x18e   : > { %v537_v24 = vpop.f32.mrb[0].mxu0 }
 0x18f   : > { %v538_v25 = vadd.f32 %v537_v24, %v460_v21  ;;  %v627_v26 = vpop.f32.mrb[0].mxu1  ;;  %v1998_v27 = vpop.f32.mrb[1].mxu0  ;;  %v464_v21 = vrot.slane %v1987_v18, %v1992_v20 }
 0x190   : > { %v628_v28 = vadd.f32 %v627_v26, %v551_v22  ;;  %v629_v29 = vpop.f32.mrb[1].mxu1 }
 0x191   : > { %v715_v30 = vsel %vm714_vm2, %v538_v25, 0.0  ;;  %v630_v31 = vadd.f32 %v629_v29, %v555_v23 }
 0x192   : > { %v716_v32 = vrot.slane %v715_v30, 4  ;;  %v725_v33 = vsel %vm714_vm2, %v628_v28, 0.0 }
 0x193   : > { %v726_v34 = vrot.slane %v725_v33, 4  ;;  %734 = vxpose.xlu1.b32.start.end [1/1] (short) (narrow) %v630_v31, 8  ;;  %v710_v58 = vpop.f32.mrb[2].mxu0 }
 0x194   : > { %v717_v35 = vadd.f32 %v716_v32, %v715_v30  ;;  %v711_v59 = vadd.f32 %v1280_v56, %v710_v58  ;;  %v1309_v60 = vpop.f32.mrb[3].mxu0 }
 0x195   : > { %v727_v36 = vadd.f32 %v726_v34, %v725_v33 }
 0x196   : > { %v718_v37 = vrot.slane %v717_v35, 2  ;;  %1316 = vmatpush3.msra.mxu0 %v711_v59 }
 0x197   : > { %v728_v38 = vrot.slane %v727_v36, 2  ;;  %1325 = vmatprep.subr.mxu0 %v1662_v0 }
 0x198   : > { %v719_v39 = vadd.f32 %v718_v37, %v717_v35 }
 0x199   : > { %v729_v40 = vadd.f32 %v728_v38, %v727_v36 }
 0x19a   : > { %v720_v41 = vrot.slane %v719_v39, 1 }
 0x19b   : > { %v730_v44 = vrot.slane %v729_v40, 1 }
 0x19c   : > { %v721_v47 = vadd.f32 %v720_v41, %v719_v39 }
 0x19d   : > { %v731_v48 = vadd.f32 %v730_v44, %v729_v40 }
 0x19e   : > { %v723_v51 = vmul.f32 0.125, %v721_v47 }
 0x19f   : > { %v732_v50 = vmul.f32 0.125, %v731_v48 }
 0x1a0   : > { %v724_v53 = vsub.f32 %v538_v25, %v723_v51 }
 0x1a1   : > { %v733_v52 = vsub.f32 %v628_v28, %v732_v50 }
 0x1a3   : > { %939 = vrot.lane.b32.xlu0 %v733_v52, %s1665_s18  ;;  %1311 = vmatpush3.xpose.msk.msra.mxu1 %vm770_vm3, %v733_v52 }
 0x1a4   : > { %1320 = vmatprep.subr.mxu1 %v1662_v0 }
 0x1a6   : > { %1313 = vmatmul.mubr.msk.f32.vlgmr.msra.gmra.mrb[2].mxu1 %vm770_vm3, %v724_v53 }
 0x1a7   : > { %937 = vrot.lane.b32.xlu0 %v724_v53, %s1665_s18  ;;  %1322 = vmatprep.mubr.msk.f32.mxu1 %vm1663_vm1, %v1662_v0 }
 0x213   : > { %v750_v57 = vpop.trf.xlu1 }
 0x214   : > { %v769_v61 = vrot.slane %v750_v57, %v1982_v17  ;;  %v936_v3 = vrot.slane %v750_v57, %v1992_v20 }
 0x215   : > { %v940_v54 = vpop.permute.xlu0 %939 }
 0x216   : > { %1321 = vmatpush3.xpose.msk.msra.mxu1 %vm770_vm3, %v940_v54 }
 0x219   : > { %v938_v55 = vpop.permute.xlu0 %937 }
 0x21a   : > { %1323 = vmatmul.mubr.msk.f32.vlgmr.msra.gmra.mrb[4].mxu1 %vm770_vm3, %v938_v55 }
 0x279   : > { %v843_v62 = vpop.f32.mrb[2].mxu1 }
 0x27a   : > { %v844_v63 = vadd.f32 %v843_v62, %v769_v61  ;;  %v1314_v1 = vpop.f32.mrb[3].mxu1 }
 0x27c   : > { %v848_v2 = vsel %vm847_vm4, %v844_v63, -inf }
 0x27d   : > { %849 = vmax.xlane.f32.xlu1 %v848_v2 }
 0x2ed   : > { %v1011_v4 = vpop.f32.mrb[4].mxu1 }
 0x2ee   : > { %v1012_v5 = vadd.f32 %v1011_v4, %v936_v3  ;;  %v1324_v6 = vpop.f32.mrb[5].mxu1 }
 0x2f0   : > { %v1015_v7 = vsel %vm847_vm4, %v1012_v5, -inf }
 0x2f1   : > { %1016 = vmax.xlane.f32.xlu0 %v1015_v7 }
 0x307   : > { %1026 = vrot.lane.b32.xlu0 %v711_v59, %s1665_s18 }
 0x30a   : > { %v850_v8 = vpop.xlane.xlu1 %849 }
 0x30b   : > { %v851_v9 = vsub.f32 %v844_v63, %v850_v8 }
 0x30d   : > { %v852_v10 = vmul.f32 1.442695, %v851_v9 }
 0x30f   : > { %1425 = vpow2.f32 %v852_v10 }
 0x319   : > { %v1426_v11 = vpop.eup %1425 }
 0x31a   : > { %1318 = vmatmul.mubr.msk.f32.vlgmr.msra.gmra.mrb[4].mxu0 %vm847_vm4, %v1426_v11  ;;  %v854_v12 = vsel %vm847_vm4, %v1426_v11, 0.0 }
 0x31b   : > { %1327 = vmatprep.mubr.msk.f32.mxu0 %vm1663_vm1, %v1662_v0  ;;  %v540_v0 = vadd.f32 %v1998_v27, %v464_v21 }
 0x326   : > { %855 = vadd.xlane.f32.xlu0 %v854_v12 }
 0x37e   : > { %v1017_v13 = vpop.xlane.xlu0 %1016 }
 0x37f   : > { %v1018_v14 = vsub.f32 %v1012_v5, %v1017_v13 }
 0x381   : > { %v1019_v15 = vmul.f32 1.442695, %v1018_v14 }
 0x382   : > { %v1027_v16 = vpop.permute.xlu0 %1026 }
 0x383   : > { %1427 = vpow2.f32 %v1019_v15  ;;  %1326 = vmatpush3.msra.mxu0 %v1027_v16 }
 0x38d   : > { %v1428_v17 = vpop.eup %1427 }
 0x38e   : > { %1328 = vmatmul.mubr.msk.f32.vlgmr.msra.gmra.mrb[6].mxu0 %vm847_vm4, %v1428_v17  ;;  %v1021_v19 = vsel %vm847_vm4, %v1428_v17, 0.0 }
 0x38f   : > { %1022 = vadd.xlane.f32.xlu1 %v1021_v19 }
 0x3a0   : > { %1104 = vrot.lane.b32.xlu1 %v540_v0, %s1665_s18 }
 0x3b3   : > { %v856_v18 = vpop.xlane.xlu0 %855 }
 0x3ed   : > { %v927_v22 = vpop.f32.mrb[4].mxu0 }
 0x3ee   : > { %v1319_v23 = vpop.f32.mrb[5].mxu0 }
 0x41c   : > { %v1023_v24 = vpop.xlane.xlu1 %1022 }
 0x41d   : > { %1429 = vrcp.f32 %v1023_v24 }
 0x41e   : > { %1431 = vrcp.f32 %v856_v18 }
 0x420   : > { %v1105_v30 = vpop.permute.xlu1 %1104 }
 0x427   : > { %v1430_v25 = vpop.eup %1429 }
 0x428   : > { %v1432_v20 = vpop.eup %1431 }
 0x429   : > { %v931_v27 = vmul.f32 %v1432_v20, %v927_v22 }
 0x42b   : > { %v932_v32 = vadd.f32 %v931_v27, %v540_v0 }
 0x461   : > { %v1098_v26 = vpop.f32.mrb[6].mxu0 }
 0x462   : > { %v1102_v28 = vmul.f32 %v1430_v25, %v1098_v26  ;;  %v1329_v29 = vpop.f32.mrb[7].mxu0 }
 0x464   : > { %v1107_v31 = vadd.f32 %v1105_v30, %v1102_v28 }
 0x466   : > { %1109 = vrot.lane.b32.xlu1 %v1107_v31, %s1666_s3 }
 0x4d8   : > { %v1110_v33 = vpop.permute.xlu1 %1109 }
 0x4d9   : > { %v1112_v34 = vsel %vm770_vm3, %v932_v32, %v1110_v33 }
 0x4da   : > { %1113 = vst.msk [vmem:[%s447_s17] sm:$0xff] %vm714_vm2, %v1112_v34 }
 0x4db   : > { %1592 = shalt.err (!%p1589_p2)
}
 0x4dc   : > { %s1593_s28 = scalar_lea.hbm %s2047_s15, 128  ;;  %s1597_s25 = scalar_lea.hbm %s2102_s9, 256 }
 0x4dd   : > { %p1594_p5 = scmp.ne.s32.totalorder %s2047_s15, %s1593_s28  ;;  %p1598_p0 = scmp.lt.u32.totalorder %s2047_s15, %s2102_s9 }
 0x4de   : > { %p1599_p7 = scmp.lt.u32.totalorder %s1597_s25, %s1593_s28  ;;  %p1601_p6 = scmp.lt.u32.totalorder %s1593_s28, %s2047_s15 }
 0x4df   : > { %p1595_p12 = pnand %p1594_p5, %p2152_p10 }
 0x4e0   : > { %p1600_p1 = por %p1599_p7, %p1598_p0 }
 0x4e1   : > { %p1596_p3 = pneg %p1595_p12 }
 0x4e2   : > { %p1602_p8 = por %p1601_p6, %p1600_p1 }
 0x4e4   : > { %p1603_p9 = pnand %p1602_p8, %p1596_p3 }
 0x4e6   : > { %1606 = shalt.err (!%p1603_p9)
}
 0x4e7   : > { %1355 = dma.vmem_to_hbm [thread:$0]  (%p2152_p10), %s2049_s14, 128, %s2047_s15, %s1115_s24  }
 0x4e8 PF: > { %s2153_s12 = sld [smem:[#allocation16_spill]]  ;;  %s2154_s27 = sld [smem:[#allocation18_spill]] }
 0x4e9   : > { %s2155_s3 = sld [smem:[#allocation17_spill]] }
 0x4ee   : > { %s1140_s23 = sand.u32 1, %s2153_s12   ;;  %p2156_p11 = scmp.ne.s32.totalorder %s2154_s27, 0 }
 0x4ef   : > { %p2157_p4 = scmp.ge.s32.totalorder %s2155_s3, 2  ;;  %s1141_s17 = scalar_lea.sflag [#allocation4], %s1140_s23 }
 0x4f1   : > { %p1375_p13 = pnand %p2157_p4, %p2156_p11 }
 0x4f3   : > { %1636 = dma.done.wait (!%p1375_p13), %s1141_s17, 128  }
 0x4f4   : > { %1638 = vsyncadd (!%p1375_p13), %s1141_s17, 4294967168  ;;  %s2158_s12 = sld [smem:[#allocation19_spill]]  ;;  %s2159_s19 = sld [smem:[#allocation20_spill]] }
 0x4f5   : > { %s2160_s30 = smov %s1645_s10  ;;  %s2161_s10 = smov %s1649_s11 }
 0x4fa   : > { %p26_p2 = scmp.ge.s32.totalorder %s2158_s12, 4   ;;  %s2162_s11 = smov %s2159_s19 }
 0x4fc   :  { %28 = sbr.rel (!%p26_p2) target bundleno = 11 (0xb), region = 133 }
 0x503   :  { %1146 = vsyncpa [#allocation3], 1 }
 0x504   :  { %1148 = vsyncpa [#allocation3 + $0x1], 1 }
 0x505   :  { %1149 = vsyncpa [#allocation6], 1 }
 0x506   :  { %1151 = vsyncpa [#allocation6 + $0x1], 1 }
 0x507   :  { %1152 = vsyncpa [#allocation9], 1 }
 0x508   :  { %1153 = vsyncpa [#allocation4], 1 }
 0x509   :  { %1155 = vsyncpa [#allocation4 + $0x1], 1 }

</bundles_post_ra>
